<compile_context>
chip_gen: v7x
topology: tpu7x:2x2x1
jax: 0.10.0
libtpu: 0.0.40
codegen_flags: <defaults>
</compile_context>

<pallas_src>
import jax
import jax.numpy as jnp
from jax import lax
from jax.experimental import pallas as pl
from jax.experimental.pallas import tpu as pltpu

F32 = jnp.float32
BF16 = jnp.bfloat16
VMEM = pltpu.MemorySpace.VMEM

H_LSTM = 200                              # nn.LSTM(hidden_size=200)
H_PAD = ((H_LSTM + 127) // 128) * 128     # 256: lane-aligned gate stripe

_POOL_TILE_BYTES = 5 << 20                # ~5 MiB input tile (fits v7x comfortably)


def _vmem_capacity():
    try:
        return int(pltpu.get_tpu_info().vmem_capacity_bytes)
    except Exception:
        return 64 << 20


def _nbytes(a):
    return int(a.size) * jnp.dtype(a.dtype).itemsize


# --------------------------- attention pooling ------------------------------
# x = matmul(softmax(attention_pool1(x), dim=1).transpose(-1,-2), x).squeeze(-2)
# Input is viewed as (B, bins, L, H); output is written TIME-MAJOR (bins, B, H)
# directly via the out_specs index_map (eliminates the XLA transpose between
# the two kernels).
def _attn_pool_kernel(x_ref, w_ref, b_ref, out_ref):
    x = x_ref[...][:, 0]                                         # (tb, L, H)
    scores = jnp.sum(x * w_ref[...], axis=-1) + b_ref[0, 0]      # (tb, L)
    p = jax.nn.softmax(scores, axis=1)                           # softmax over L (dim=1)
    out_ref[0] = jnp.sum(p[:, :, None] * x, axis=1)              # (tb, H) weighted sum


def attention_pool(x4, w, b):
    bsz, nbins, seq_l, h = x4.shape
    row_bytes = seq_l * h * 4
    tb = _POOL_TILE_BYTES // max(1, row_bytes)
    if tb >= bsz or bsz <= 8:
        tb = bsz                                   # full batch per bin
    else:
        tb = max(8, min(bsz, (tb // 8) * 8))       # (8,·) aligned row tile
    tile_bytes = tb * row_bytes
    vmem_limit = int(min(0.9 * _vmem_capacity(),
                         max(16 << 20, 5 * tile_bytes + (8 << 20))))
    return pl.pallas_call(
        _attn_pool_kernel,
        out_shape=jax.ShapeDtypeStruct((nbins, bsz, h), F32),     # time-major
        grid=(nbins, pl.cdiv(bsz, tb)),
        in_specs=[pl.BlockSpec((tb, 1, seq_l, h), lambda n, i: (i, n, 0, 0)),
                  pl.BlockSpec((1, 1, h), lambda n, i: (0, 0, 0)),
                  pl.BlockSpec((1, 1), lambda n, i: (0, 0))],
        out_specs=pl.BlockSpec((1, tb, h), lambda n, i: (n, i, 0)),
        compiler_params=pltpu.CompilerParams(
            dimension_semantics=("parallel", "parallel"),
            vmem_limit_bytes=vmem_limit),
    )(x4, w, b)


# --------------- fused 2-layer BiLSTM + mean(1) + fc1 head -------------------
def bilstm_head_fused(x_tm, p, batch, n_steps, hp):
    """x_tm: (n_steps*batch, D_in) time-major pooled features (row = t*B + b)."""
    l1, l2 = p["lstm"]
    B, N, HP = batch, n_steps, hp

    # Layer-1 weights / biases / fc head stay resident in VMEM (auto copy-in);
    # layer-2 matrices (largest) stay in HBM and are DMA'd behind layer-1 compute.
    vmem_args = (x_tm,
                 l1["w_ih_f"], l1["w_hh_f"], l1["b_f"],
                 l1["w_ih_b"], l1["w_hh_b"], l1["b_b"],
                 l2["b_f"], l2["b_b"],
                 p["fc_w1"], p["fc_b1"], p["fc_w2"], p["fc_b2"])
    any_args = (l2["w_ih_f"], l2["w_hh_f"], l2["w_ih_b"], l2["w_hh_b"])

    def kernel(x_ref,
               wif1, whf1, bf1, wib1, whb1, bb1,
               bf2, bb2, fw1, fb1, fw2, fb2,
               wif2_hbm, whf2_hbm, wib2_hbm, whb2_hbm,
               out_ref,
               h1_ref, wif2_v, whf2_v, wib2_v, whb2_v, dma_sem):

        # Start the layer-2 weight DMA now; it overlaps with layer-1 compute.
        copies = (pltpu.make_async_copy(wif2_hbm, wif2_v, dma_sem.at[0]),
                  pltpu.make_async_copy(whf2_hbm, whf2_v, dma_sem.at[1]),
                  pltpu.make_async_copy(wib2_hbm, wib2_v, dma_sem.at[2]),
                  pltpu.make_async_copy(whb2_hbm, whb2_v, dma_sem.at[3]))
        for cp in copies:
            cp.start()

        def cell(gates, c_prev):
            # PyTorch gate order i, f, g, o; each stripe is HP=256 lanes (aligned).
            # Padded lanes: gate preacts are 0 there (zero-padded weights/bias),
            # c_prev padded lanes are 0 -> c,h padded lanes provably stay 0.
            i = jax.nn.sigmoid(gates[:, 0 * HP:1 * HP])
            f = jax.nn.sigmoid(gates[:, 1 * HP:2 * HP])
            g = jnp.tanh(gates[:, 2 * HP:3 * HP])
            o = jax.nn.sigmoid(gates[:, 3 * HP:4 * HP])
            c = f * c_prev + i * g
            return o * jnp.tanh(c), c

        def run_layer(inp, w_ih_f, w_hh_f, b_f, w_ih_b, w_hh_b, b_b,
                      sink_f, sink_b):
            # Hoisted input projection: ONE big MXU matmul per direction
            # (M = N*B), bias folded in once.
            gxf = jnp.dot(inp, w_ih_f, preferred_element_type=F32) + b_f
            gxb = jnp.dot(inp, w_ih_b, preferred_element_type=F32) + b_b
            # Forward chain: all N consecutive matmuls share the SAME RHS
            # (w_hh_f) -> Mosaic can latch the MXU weights instead of
            # re-pushing them every timestep.
            h = jnp.zeros((B, HP), F32)
            c = jnp.zeros((B, HP), F32)
            for t in range(N):                      # bins is small & static: unroll
                g = gxf[t * B:(t + 1) * B, :] + jnp.dot(
                    h, w_hh_f, preferred_element_type=F32)
                h, c = cell(g, c)
                sink_f(t, h)
            # Backward chain: constant RHS w_hh_b.
            h = jnp.zeros((B, HP), F32)
            c = jnp.zeros((B, HP), F32)
            for s in range(N - 1, -1, -1):
                g = gxb[s * B:(s + 1) * B, :] + jnp.dot(
                    h, w_hh_b, preferred_element_type=F32)
                h, c = cell(g, c)
                sink_b(s, h)

        # ---- layer 1: build the (N*B, 2*HP) bidirectional sequence in VMEM ----
        def sink1_f(t, h):
            h1_ref[t * B:(t + 1) * B, 0:HP] = h           # forward output at time t
        def sink1_b(s, h):
            h1_ref[s * B:(s + 1) * B, HP:2 * HP] = h      # backward output at time s
        run_layer(x_ref[...],
                  wif1[...].astype(F32), whf1[...].astype(F32), bf1[...],
                  wib1[...].astype(F32), whb1[...].astype(F32), bb1[...],
                  sink1_f, sink1_b)

        # ---- layer 2 + fused mean over bins (no (B,bins,400) HBM round trip) ----
        for cp in copies:                                  # layer-2 weights ready
            cp.wait()
        acc = {"f": jnp.zeros((B, HP), F32), "b": jnp.zeros((B, HP), F32)}
        def sink2_f(t, h):
            acc["f"] = acc["f"] + h
        def sink2_b(s, h):
            acc["b"] = acc["b"] + h
        run_layer(h1_ref[...],
                  wif2_v[...].astype(F32), whf2_v[...].astype(F32), bf2[...],
                  wib2_v[...].astype(F32), whb2_v[...].astype(F32), bb2[...],
                  sink2_f, sink2_b)

        mean = jnp.concatenate([acc["f"], acc["b"]], axis=1) * (1.0 / N)  # (B, 2*HP)
        hdn = jnp.maximum(
            jnp.dot(mean, fw1[...], preferred_element_type=F32) + fb1[...], 0.0)
        out_ref[...] = jnp.dot(hdn, fw2[...], preferred_element_type=F32) + fb2[...]

    # Footprint-accurate VMEM limit (no blanket 2x), capped from device info.
    any_bytes = sum(_nbytes(a) for a in any_args)
    lstm_w_bytes = any_bytes + sum(
        _nbytes(l1[k]) for k in ("w_ih_f", "w_hh_f", "w_ih_b", "w_hh_b"))
    h1_bytes = N * B * 2 * HP * 4
    gx_bytes = 4 * N * B * 4 * HP * 4                 # gxf/gxb temporaries (2 layers)
    footprint = (sum(_nbytes(a) for a in vmem_args) + B * 4
                 + any_bytes + h1_bytes               # scratch buffers
                 + 3 * lstm_w_bytes + gx_bytes)       # in-kernel f32 weight casts + temps
    vmem_limit = int(min(0.9 * _vmem_capacity(),
                         max(24 << 20, footprint + (12 << 20))))

    return pl.pallas_call(
        kernel,
        out_shape=jax.ShapeDtypeStruct((B, 1), F32),
        in_specs=[pl.BlockSpec(memory_space=VMEM)] * len(vmem_args)
                 + [pl.BlockSpec(memory_space=pl.ANY)] * len(any_args),
        out_specs=pl.BlockSpec(memory_space=VMEM),
        scratch_shapes=[pltpu.VMEM((N * B, 2 * HP), F32)]            # layer-1 sequence
                       + [pltpu.VMEM(tuple(a.shape), a.dtype) for a in any_args]
                       + [pltpu.SemaphoreType.DMA((4,))],
        compiler_params=pltpu.CompilerParams(vmem_limit_bytes=vmem_limit),
    )(*(vmem_args + any_args))


# ------------------------------ forward glue ---------------------------------
def finetune_forward(x, kparams, bins, lstm_hidden=H_LSTM):
    # x: (B*bins, L, hidden) — output of the (identity) pretrain_model.
    bn, seq_l, hidden = x.shape
    bsz = bn // bins
    hp = ((lstm_hidden + 127) // 128) * 128
    x4 = x.reshape(bsz, bins, seq_l, hidden)                     # '(b n) ...' -> (b, n, ...)
    pooled = attention_pool(x4, kparams["w_att"], kparams["b_att"])   # (bins, B, hidden)
    x_tm = pooled.reshape(bins * bsz, hidden)                    # time-major, free reshape
    return bilstm_head_fused(x_tm, kparams, bsz, bins, hp)       # (B, 1)


# --------------------- weight padding (lane-aligned gates) -------------------
def _pad_gate_cols(m, h, hp):
    # (..., 4*h) -> (..., 4*hp): each i/f/g/o block zero-padded to hp lanes.
    parts = []
    for k in range(4):
        blk = m[..., k * h:(k + 1) * h]
        parts.append(jnp.pad(blk, [(0, 0)] * (m.ndim - 1) + [(0, hp - h)]))
    return jnp.concatenate(parts, axis=-1)


def _pad_row_blocks(m, h, hp, nblk):
    # (nblk*h, C) -> (nblk*hp, C): each row block zero-padded to hp rows.
    parts = []
    for k in range(nblk):
        blk = m[k * h:(k + 1) * h]
        parts.append(jnp.pad(blk, [(0, hp - h)] + [(0, 0)] * (m.ndim - 1)))
    return jnp.concatenate(parts, axis=0)


def pad_params(params, h=H_LSTM, hp=H_PAD):
    """Zero-pad LSTM/head weights from hidden=200 to the 256-lane gate layout."""
    out = dict(params)
    lstm = []
    for li, lp in enumerate(params["lstm"]):
        q = {}
        for d in ("f", "b"):
            wih = _pad_gate_cols(lp[f"w_ih_{d}"], h, hp)
            if li > 0:  # layer>0 input is concat(fwd, bwd): 2*h rows -> 2*hp rows
                wih = _pad_row_blocks(wih, h, hp, 2)
            q[f"w_ih_{d}"] = wih
            q[f"w_hh_{d}"] = _pad_row_blocks(_pad_gate_cols(lp[f"w_hh_{d}"], h, hp), h, hp, 1)
            q[f"b_{d}"] = _pad_gate_cols(lp[f"b_{d}"], h, hp)
        lstm.append(q)
    out["lstm"] = lstm
    out["fc_w1"] = _pad_row_blocks(params["fc_w1"], h, hp, 2)
    return out


def bf16_round_lstm(params):
    """bf16 round-trip on the LSTM matrices (weight storage dtype of the model)."""
    out = dict(params)
    lstm = []
    for lp in params["lstm"]:
        q = dict(lp)
        for k in ("w_ih_f", "w_hh_f", "w_ih_b", "w_hh_b"):
            q[k] = lp[k].astype(BF16).astype(F32)
        lstm.append(q)
    out["lstm"] = lstm
    return out


def kernel_params(params, h=H_LSTM, hp=H_PAD):
    """Padded, bf16-stored LSTM matrices for the kernel (biases / fc stay f32)."""
    padded = pad_params(params, h, hp)
    lstm = []
    for lp in padded["lstm"]:
        q = dict(lp)
        for k in ("w_ih_f", "w_hh_f", "w_ih_b", "w_hh_b"):
            q[k] = lp[k].astype(BF16)
        lstm.append(q)
    padded["lstm"] = lstm
    return padded


# --------------------------- pure-JAX reference ------------------------------
def _ref_pool(x, w, b):
    scores = jnp.sum(x * w, axis=-1) + b[0, 0]
    p = jax.nn.softmax(scores, axis=1)
    return jnp.sum(p[:, :, None] * x, axis=1)


def _ref_lstm_dir(x_nbd, w_ih, w_hh, b):
    hdim = w_hh.shape[0]
    bsz = x_nbd.shape[1]

    def step(carry, xt):
        hh, cc = carry
        gates = xt @ w_ih + hh @ w_hh + b
        i = jax.nn.sigmoid(gates[:, :hdim])
        f = jax.nn.sigmoid(gates[:, hdim:2 * hdim])
        g = jnp.tanh(gates[:, 2 * hdim:3 * hdim])
        o = jax.nn.sigmoid(gates[:, 3 * hdim:])
        cc = f * cc + i * g
        hh = o * jnp.tanh(cc)
        return (hh, cc), hh

    init = (jnp.zeros((bsz, hdim), F32), jnp.zeros((bsz, hdim), F32))
    _, hs = lax.scan(step, init, x_nbd)
    return hs


def _ref_forward(x, params, bins):
    bn, _, hidden = x.shape
    bsz = bn // bins
    pooled = _ref_pool(x, params["w_att"], params["b_att"])
    xt = jnp.transpose(pooled.reshape(bsz, bins, hidden), (1, 0, 2))  # (N, B, C)
    for lp in params["lstm"]:
        fwd = _ref_lstm_dir(xt, lp["w_ih_f"], lp["w_hh_f"], lp["b_f"])
        bwd = jnp.flip(_ref_lstm_dir(jnp.flip(xt, 0),
                                     lp["w_ih_b"], lp["w_hh_b"], lp["b_b"]), 0)
        xt = jnp.concatenate([fwd, bwd], axis=-1)
    y = jnp.transpose(xt, (1, 0, 2))                                  # (B, N, 400)
    m = jnp.mean(y, axis=1)
    h = jnp.maximum(m @ params["fc_w1"] + params["fc_b1"], 0.0)
    return h @ params["fc_w2"] + params["fc_b2"]


# ------------------------------- parameters ----------------------------------
def init_params(key, hidden_dim, lstm_hidden=H_LSTM):
    ks = iter(jax.random.split(key, 32))

    def w(shape, scale=0.05):
        return (scale * jax.random.normal(next(ks), shape)).astype(F32)

    lstm = []
    for d_in in (hidden_dim, 2 * lstm_hidden):                   # layer 0, layer 1
        lstm.append(dict(
            w_ih_f=w((d_in, 4 * lstm_hidden)),
            w_hh_f=w((lstm_hidden, 4 * lstm_hidden)),
            b_f=w((1, 4 * lstm_hidden)),                         # bias_ih + bias_hh folded
            w_ih_b=w((d_in, 4 * lstm_hidden)),
            w_hh_b=w((lstm_hidden, 4 * lstm_hidden)),
            b_b=w((1, 4 * lstm_hidden)),
        ))
    return dict(
        w_att=w((1, 1, hidden_dim)), b_att=w((1, 1)),            # attention_pool1: Linear(H, 1)
        lstm=lstm,
        fc_w1=w((2 * lstm_hidden, 128)), fc_b1=w((1, 128)),      # fc1[0]
        fc_w2=w((128, 1)), fc_b2=w((1, 1)),                      # fc1[2]
    )


if __name__ == "__main__":
    B, bins, seq, hidden = 2, 8, 8, 32
    key = jax.random.PRNGKey(0)
    kx, kp = jax.random.split(key)
    x = jax.random.normal(kx, (B * bins, seq, hidden), dtype=F32)

    params = init_params(kp, hidden)
    ref_params = bf16_round_lstm(params)        # model with bf16-stored LSTM weights
    kparams = kernel_params(ref_params)         # lane-aligned padded + bf16 storage

    out = jax.block_until_ready(finetune_forward(x, kparams, bins))
    ref = jax.block_until_ready(_ref_forward(x, ref_params, bins))

    assert out.shape == (B, 1), out.shape
    assert jnp.allclose(out, ref, rtol=1e-3, atol=1e-3), (out, ref)
    print("KERNEL_OK")
</pallas_src>

<mosaic_0001>
module attributes {stable_mosaic.version = 11 : i64} {
  func.func @_attn_pool_kernel(%arg0: i32, %arg1: i32, %arg2: memref<2x1x8x32xf32, #tpu.memory_space<vmem>>, %arg3: memref<1x1x32xf32, #tpu.memory_space<vmem>>, %arg4: memref<1x1xf32, #tpu.memory_space<vmem>>, %arg5: memref<1x2x32xf32, #tpu.memory_space<vmem>>) attributes {dimension_semantics = [#tpu.dimension_semantics<parallel>, #tpu.dimension_semantics<parallel>], iteration_bounds = array<i64: 8, 1>, scalar_prefetch = 0 : i64, scratch_operands = 0 : i64, tpu.core_type = #tpu.core_type<tc>, window_params = [{transform_indices = @transform_0, window_bounds = array<i64: 2, 1, 8, 32>}, {pipeline_mode = #tpu.pipeline_mode<synchronous>, transform_indices = @transform_1, window_bounds = array<i64: 1, 1, 32>}, {pipeline_mode = #tpu.pipeline_mode<synchronous>, transform_indices = @transform_2, window_bounds = array<i64: 1, 1>}, {transform_indices = @transform_3, window_bounds = array<i64: 1, 2, 32>}]} {
    %c0 = arith.constant 0 : index
    %c0_0 = arith.constant 0 : index
    %c0_1 = arith.constant 0 : index
    %c0_2 = arith.constant 0 : index
    %0 = vector.load %arg2[%c0, %c0_0, %c0_1, %c0_2] : memref<2x1x8x32xf32, #tpu.memory_space<vmem>>, vector<2x1x8x32xf32>
    %1 = vector.shape_cast %0 : vector<2x1x8x32xf32> to vector<2x8x32xf32>
    %c0_3 = arith.constant 0 : index
    %c0_4 = arith.constant 0 : index
    %c0_5 = arith.constant 0 : index
    %2 = vector.load %arg3[%c0_3, %c0_4, %c0_5] : memref<1x1x32xf32, #tpu.memory_space<vmem>>, vector<1x1x32xf32>
    %3 = vector.broadcast %2 : vector<1x1x32xf32> to vector<2x8x32xf32>
    %4 = arith.mulf %1, %3 : vector<2x8x32xf32>
    %cst = arith.constant dense<0.000000e+00> : vector<2x8xf32>
    %5 = vector.multi_reduction <add>, %4, %cst [2] : vector<2x8x32xf32> to vector<2x8xf32>
    %c0_6 = arith.constant 0 : index
    %c0_7 = arith.constant 0 : index
    %6 = vector.load %arg4[%c0_6, %c0_7] : memref<1x1xf32, #tpu.memory_space<vmem>>, vector<1x1xf32>
    %7 = vector.extract %6[0, 0] : f32 from vector<1x1xf32>
    %8 = vector.broadcast %7 : f32 to vector<2x8xf32>
    %9 = arith.addf %5, %8 : vector<2x8xf32>
    %cst_8 = arith.constant dense<0xFF800000> : vector<2xf32>
    %10 = vector.multi_reduction <maximumf>, %9, %cst_8 [1] : vector<2x8xf32> to vector<2xf32>
    %cst_9 = arith.constant 0xFF800000 : f32
    %11 = vector.broadcast %cst_9 : f32 to vector<2xf32>
    %12 = arith.maximumf %11, %10 : vector<2xf32>
    %13 = vector.shape_cast %12 : vector<2xf32> to vector<2x1xf32>
    %14 = vector.broadcast %13 : vector<2x1xf32> to vector<2x8xf32>
    %15 = arith.subf %9, %14 : vector<2x8xf32>
    %16 = math.exp %15 : vector<2x8xf32>
    %cst_10 = arith.constant dense<0.000000e+00> : vector<2xf32>
    %17 = vector.multi_reduction <add>, %16, %cst_10 [1] : vector<2x8xf32> to vector<2xf32>
    %18 = vector.shape_cast %17 : vector<2xf32> to vector<2x1xf32>
    %19 = vector.broadcast %18 : vector<2x1xf32> to vector<2x8xf32>
    %20 = arith.divf %16, %19 : vector<2x8xf32>
    %21 = vector.shape_cast %20 : vector<2x8xf32> to vector<2x8x1xf32>
    %22 = vector.broadcast %21 : vector<2x8x1xf32> to vector<2x8x32xf32>
    %23 = arith.mulf %22, %1 : vector<2x8x32xf32>
    %cst_11 = arith.constant dense<0.000000e+00> : vector<2x32xf32>
    %24 = vector.multi_reduction <add>, %23, %cst_11 [1] : vector<2x8x32xf32> to vector<2x32xf32>
    %c0_12 = arith.constant 0 : index
    %c0_13 = arith.constant 0 : index
    %c0_14 = arith.constant 0 : index
    %25 = vector.load %arg5[%c0_12, %c0_13, %c0_14] : memref<1x2x32xf32, #tpu.memory_space<vmem>>, vector<1x2x32xf32>
    %26 = vector.shape_cast %25 : vector<1x2x32xf32> to vector<2x32xf32>
    %27 = vector.shape_cast %24 : vector<2x32xf32> to vector<1x2x32xf32>
    tpu.vector_store %arg5[%c0_12, %c0_13, %c0_14], %27 {strides = array<i32>} : memref<1x2x32xf32, #tpu.memory_space<vmem>>, vector<1x2x32xf32>,
    return
  }
  func.func @transform_0(%arg0: i32, %arg1: i32) -> (i32, i32, i32, i32) {
    %c0_i32 = arith.constant 0 : i32
    %c0_i32_0 = arith.constant 0 : i32
    %c0_i32_1 = arith.constant 0 : i32
    return %arg1, %arg0, %c0_i32, %c0_i32_0 : i32, i32, i32, i32
  }
  func.func @transform_1(%arg0: i32, %arg1: i32) -> (i32, i32, i32) {
    %c0_i32 = arith.constant 0 : i32
    %c0_i32_0 = arith.constant 0 : i32
    %c0_i32_1 = arith.constant 0 : i32
    %c0_i32_2 = arith.constant 0 : i32
    return %c0_i32, %c0_i32_0, %c0_i32_1 : i32, i32, i32
  }
  func.func @transform_2(%arg0: i32, %arg1: i32) -> (i32, i32) {
    %c0_i32 = arith.constant 0 : i32
    %c0_i32_0 = arith.constant 0 : i32
    %c0_i32_1 = arith.constant 0 : i32
    return %c0_i32, %c0_i32_0 : i32, i32
  }
  func.func @transform_3(%arg0: i32, %arg1: i32) -> (i32, i32, i32) {
    %c0_i32 = arith.constant 0 : i32
    %c0_i32_0 = arith.constant 0 : i32
    return %arg0, %arg1, %c0_i32 : i32, i32, i32
  }
}

</mosaic_0001>

<bundles_post_ra>
// kernel: tpu_custom_call.1
= control target key start
LH: loop header
LB: loop body
LE: loop exit
PB: predicated region body
PF: predicated region fallthrough
CT: control target
= control target key end

     0   :  { %s858_s0 = inlined_call_operand.hbm [shape: f32[2,8,8,32], index: 0, kind: input, shape index: {}]   ;;  %s859_s1 = inlined_call_operand.vmem [shape: f32[1,1,32], index: 1, kind: input, shape index: {}]   ;;  %s860_s2 = inlined_call_operand.<no memory space> [shape: f32[1,1], index: 2, kind: input, shape index: {}]   ;;  %s861_s3 = inlined_call_operand.hbm [shape: f32[8,2,32], index: 3, kind: output, shape index: {}]  }
   0x1   :  { %v8_v0 = vstv %s860_s2 }
   0x2   :  { %9 = vst [vmem:[#allocation2] sm:$0x1] %v8_v0 }
   0x3   :  { %10 = vsyncpa [#allocation4], 0 }
   0x4   :  { %12 = vsyncpa [#allocation4 + $0x1], 0 }
   0x5   :  { %13 = vsyncpa [#allocation5], 0 }
   0x6   :  { %15 = vsyncpa [#allocation5 + $0x1], 0  ;;  %s668_s14 = smov 0   ;;  %s670_s15 = smov 0  }
   0x7   :  { %s672_s16 = smov 0   ;;  %s674_s17 = smov 0  }
   0x8   :  { %s676_s18 = smov 0   ;;  %s678_s19 = smov 0  }
   0x9 LB: > { %s433_s2 = sadd.s32 4294967295, %s637_s19   ;;  %s434_s20 = sadd.s32 4294967294, %s637_s19   ;;  %s637_s19 = sphi %s678_s19, %s21_s19   ;;  %s633_s18 = sphi %s676_s18, %s874_s18   ;;  %s629_s17 = sphi %s674_s17, %s873_s17   ;;  %s625_s16 = sphi %s672_s16, %s872_s16   ;;  %s621_s15 = sphi %s670_s15, %s871_s15   ;;  %s617_s14 = sphi %s668_s14, %s870_s14  }
   0xa   : > { %s33_s21 = sadd.s32 1, %s633_s18  ;;  %s42_s22 = sadd.s32 1, %s625_s16 }
   0xb   : > { %p35_p0 = scmp.ge.s32.totalorder %s33_s21, 8  ;;  %p49_p1 = scmp.ne.s32.totalorder %s625_s16, %s621_s15 }
   0xc   : > { %p50_p2 = scmp.eq.s32.totalorder %s637_s19, 0  ;;  %p55_p3 = scmp.ne.s32.totalorder %s621_s15, %s617_s14 }
   0xd   : > { %s876_s21 = smov (%p35_p0, %s33_s21), 0  ;;  %p56_p5 = scmp.eq.s32.totalorder %s433_s2, 0 }
   0xe   : > { %p709_p4 = por %p50_p2, %p49_p1  ;;  %s38_s24 = ssub.s32 %s633_s18, %s876_s21 }
   0xf   : > { %p123_p6 = scmp.eq.s32.totalorder %s433_s2, 7  ;;  %p40_p7 = scmp.eq.s32.totalorder %s38_s24, 0 }
  0x10   : > { %p715_p8 = por %p56_p5, %p55_p3  ;;  %p129_p10 = scmp.eq.s32.totalorder %s434_s20, 7 }
  0x11   : > { %p719_p9 = por %p123_p6, %p49_p1  ;;  %p461_p12 = scmp.lt.s32.totalorder %s637_s19, 8 }
  0x12   : > { %s724_s27 = scalar_select %p40_p7, %s625_s16, %s42_s22  }
  0x13   : > { %s865_s26 = scalar_select %p719_p9, 1, 0 }
  0x14   : > { %p726_p11 = por %p129_p10, %p55_p3  ;;  %s155_s29 = sand.u32 1, %s625_s16  }
  0x15   : > { %s437_s30 = sshll.u32 %s155_s29, 4  ;;  %s438_s4 = sshll.u32 %s633_s18, 7 }
  0x16   : > { %s866_s28 = scalar_select %p726_p11, 1, 0 }
  0x17   : > { %s736_s7 = scalar_lea.hbm %s858_s0, %s438_s4  ;;  %s159_s8 = scalar_lea.vmem [#allocation3], %s437_s30 }
  0x18   : > { %s168_s9 = sshll.u32 %s159_s8, 4  ;;  %p742_p13 = pnand %p461_p12, %p709_p4  ;;  %s738_s9 = int_to_ptr.vmem [resolvable:$true] %s168_s9 }
  0x19   : > { %s746_s11 = scalar_lea.sflag [#allocation4], %s155_s29  ;;  %s525_s12 = scalar_lea.hbm %s736_s7, 256 }
  0x1a   : > { %p526_p0 = scmp.ne.s32.totalorder %s736_s7, %s525_s12  ;;  %p527_p1 = pneg %p742_p13 }
  0x1b   : > { %s530_s20 = scalar_lea.hbm %s858_s0, 2048  ;;  %p531_p4 = scmp.lt.u32.totalorder %s736_s7, %s858_s0 }
  0x1c   : > { %p528_p2 = pnand %p527_p1, %p526_p0  ;;  %p532_p5 = scmp.lt.u32.totalorder %s530_s20, %s525_s12 }
  0x1d   : > { %p534_p7 = scmp.lt.u32.totalorder %s525_s12, %s736_s7 }
  0x1e   : > { %p529_p3 = pneg %p528_p2  ;;  %p533_p6 = por %p532_p5, %p531_p4 }
  0x20   : > { %p535_p10 = por %p534_p7, %p533_p6 }
  0x22   : > { %p536_p12 = pnand %p535_p10, %p529_p3 }
  0x24   : > { %539 = shalt.err (!%p536_p12)
}
  0x25   : > { %s540_s24 = scalar_lea.vmem %s738_s9, 256  ;;  %s639_s29 = smov [#allocation3]  }
  0x26   : > { %p541_p0 = scmp.ne.s32.totalorder %s738_s9, %s540_s24  ;;  %s545_s30 = sshll.u32 %s639_s29, 4  ;;  %s546_s30 = int_to_ptr.vmem [resolvable:$false] %s545_s30 }
  0x27   : > { %s547_s4 = scalar_lea.vmem %s546_s30, 512  ;;  %p548_p9 = scmp.lt.s32.totalorder %s738_s9, %s546_s30 }
  0x28   : > { %p543_p2 = pnand %p541_p0, %p527_p1  ;;  %p549_p4 = scmp.lt.s32.totalorder %s547_s4, %s540_s24 }
  0x2a   : > { %p544_p11 = pneg %p543_p2  ;;  %p550_p5 = por %p549_p4, %p548_p9 }
  0x2c   : > { %p551_p6 = pnand %p550_p5, %p544_p11 }
  0x2e   : > { %554 = shalt.err (!%p551_p6)
}
  0x2f   : > { %s640_s5 = smov 1024   ;;  %s641_s6 = smov 128  }
  0x30   : > { %s642_s8 = smov 8   ;;  %p439_p1 = scmp.ge.s32.totalorder %s637_s19, 1 }
  0x31   : > { %456 = dma.hbm_to_vmem [thread:$0]  (!%p742_p13), %s736_s7, 256, %s738_s9, %s746_s11, %s640_s5, %s641_s6, %s642_s8  }
  0x32   : > { %p176_p3 = scmp.lt.s32.totalorder %s637_s19, 9 }
  0x34   : > { %p177_p7 = pnand %p439_p1, %p176_p3 }
  0x35   : > { %s777_s12 = sand.u32 (!%p177_p7), 1, %s621_s15  }
  0x36   : > { %180 = sbr.rel (%p177_p7) target bundleno = 829 (0x33d), region = 32  ;;  %s440_s13 = sshll.u32 (!%p177_p7), %s777_s12, 4 }
  0x37   : > { %s183_s2 = scalar_lea.sflag (!%p177_p7), [#allocation4], %s777_s12  ;;  %s186_s20 = scalar_lea.vmem (!%p177_p7), [#allocation3], %s440_s13 }
  0x3d   : > { %608 = dma.done.wait (%p715_p8), %s183_s2, 256  }
  0x3e   : > { %610 = vsyncadd (%p715_p8), %s183_s2, 4294967040  ;;  %v785_v1 = vld [vmem:[%s186_s20] sm:$0xff]  ;;  %v442_v2 = vld [vmem:[%s859_s1] ss:$0 sm:$0xff]  ;;  %vm221_vm0 = vcmask 261120   ;;  %v235_v9 = vlaneseq  ;;  %vm245_vm1 = vcmask 1041409  }
  0x3f   : > { %v790_v3 = vld [vmem:[%s186_s20 + $0x8] sm:$0xff]  ;;  %v219_v4 = vmul.f32 %v442_v2, %v785_v1  ;;  %vm248_vm2 = vcmask 58368   ;;  %v643_v22 = vmov 0   ;;  %s441_s10 = sshll.u32 %s777_s12, 1  ;;  %s444_s11 = sshll.u32 %s629_s17, 5  ;;  %vm335_vm3 = vcmask 254976  }
  0x40   : > { %v220_v5 = vmul.f32 %v442_v2, %v790_v3  ;;  %v228_v6 = vld [vmem:[#allocation2] sm:$0x1]  ;;  %v236_v10 = vand.u32 127, %v235_v9  ;;  %v238_v11 = vshrl.u32 %v235_v9, 7  ;;  %516 = vset.pattern.permute.xlu0 %v643_v22  ;;  %515 = vset.pattern.permute.xlu1 %v643_v22  ;;  %s208_s22 = scalar_lea.vmem [#allocation6], %s441_s10  ;;  %s809_s30 = scalar_lea.hbm %s861_s3, %s444_s11 }
  0x41   : > { %447 = vpush %v228_v6  ;;  %v222_v7 = vsel %vm221_vm0, %v219_v4, 0.0  ;;  %s352_s23 = sshll.u32 %s208_s22, 4  ;;  %s338_s4 = scalar_lea.sflag [#allocation5], %s777_s12  ;;  %s811_s23 = int_to_ptr.vmem [resolvable:$true] %s352_s23 }
  0x42   : > { %223 = vadd.xlane.f32.xlu0 %v222_v7  ;;  %v225_v8 = vsel %vm221_vm0, %v220_v5, 0.0  ;;  %v239_v14 = vsub.s32 %v236_v10, %v238_v11  ;;  %v255_v23 = vsub.s32 0, %v238_v11  ;;  %v259_v24 = vsub.s32 1, %v238_v11  ;;  %s555_s17 = scalar_lea.vmem %s811_s23, 32  ;;  %p868_p9 = scmp.ne.s32.totalorder %s865_s26, 0 }
  0x43   : > { %p556_p8 = scmp.ne.s32.totalorder %s811_s23, %s555_s17  ;;  %s644_s5 = smov [#allocation6]  }
  0x44   : > { %s559_s6 = sshll.u32 %s644_s5, 4  ;;  %s560_s6 = int_to_ptr.vmem [resolvable:$false] %s559_s6 }
  0x45   : > { %p557_p11 = pnand %p556_p8, %p868_p9  ;;  %s561_s8 = scalar_lea.vmem %s560_s6, 64 }
  0x46   : > { %226 = vadd.xlane.f32.xlu0 %v225_v8  ;;  %p562_p10 = scmp.lt.s32.totalorder %s811_s23, %s560_s6  ;;  %p563_p12 = scmp.lt.s32.totalorder %s561_s8, %s555_s17 }
  0x47   : > { %p558_p13 = pneg %p557_p11 }
  0x48   : > { %p564_p0 = por %p563_p12, %p562_p10 }
  0x4a   : > { %p565_p2 = pnand %p564_p0, %p558_p13 }
  0x72   : > { %s448_s25 = spop %447 }
  0x73   : > { %v230_v12 = vstv %s448_s25 }
  0xcf   : > { %v224_v13 = vpop.xlane.xlu0 %223 }
  0xd0   : > { %v231_v15 = vadd.f32 %v230_v12, %v224_v13 }
  0xd2   : > { %v240_v18 = vrot.slane %v231_v15, %v239_v14 }
  0xd3   : > { %v227_v16 = vpop.xlane.xlu0 %226 }
  0xd4   : > { %v232_v17 = vadd.f32 %v230_v12, %v227_v16 }
  0xd6   : > { %v244_v19 = vrot.slane %v232_v17, %v239_v14 }
  0xd8   : > { %v246_v20 = vsel %vm245_vm1, %v244_v19, %v240_v18 }
  0xd9   : > { %v249_v21 = vsel %vm248_vm2, %v246_v20, -inf }
  0xda   : > { %250 = vmax.xlane.f32.xlu1 %v249_v21 }
 0x167   : > { %v251_v25 = vpop.xlane.xlu1 %250 }
 0x168   : > { %v256_v26 = vrot.slane %v251_v25, %v255_v23  ;;  %v260_v27 = vrot.slane %v251_v25, %v259_v24 }
 0x16a   : > { %v263_v28 = vsub.f32 %v231_v15, %v256_v26  ;;  %v264_v29 = vsub.f32 %v232_v17, %v260_v27 }
 0x16c   : > { %v265_v30 = vmul.f32 1.442695, %v263_v28  ;;  %v267_v31 = vmul.f32 1.442695, %v264_v29 }
 0x16e   : > { %517 = vpow2.f32 %v265_v30 }
 0x16f   : > { %519 = vpow2.f32 %v267_v31 }
 0x178   : > { %v518_v32 = vpop.eup %517 }
 0x179   : > { %v520_v33 = vpop.eup %519  ;;  %272 = vperm.xlu1 %515, %v518_v32  }
 0x17a   : > { %275 = vperm.xlu0 %516, %v520_v33  }
 0x1f8   : > { %v273_v34 = vpop.permute.xlu1 %272 }
 0x1f9   : > { %v276_v35 = vpop.permute.xlu0 %275  ;;  %v280_v36 = vrot.slane %v273_v34, %v239_v14 }
 0x1fa   : > { %v284_v37 = vrot.slane %v276_v35, %v239_v14 }
 0x1fc   : > { %v285_v38 = vsel %vm245_vm1, %v284_v37, %v280_v36 }
 0x1fd   : > { %v287_v39 = vsel %vm248_vm2, %v285_v38, 0.0 }
 0x1fe   : > { %288 = vadd.xlane.f32.xlu1 %v287_v39 }
 0x28b   : > { %v289_v40 = vpop.xlane.xlu1 %288 }
 0x28c   : > { %v294_v41 = vrot.slane %v289_v40, %v255_v23  ;;  %v298_v42 = vrot.slane %v289_v40, %v259_v24 }
 0x28e   : > { %521 = vrcp.f32 %v294_v41 }
 0x28f   : > { %523 = vrcp.f32 %v298_v42 }
 0x298   : > { %v522_v43 = vpop.eup %521 }
 0x299   : > { %v302_v44 = vmul.f32 %v522_v43, %v518_v32  ;;  %v524_v45 = vpop.eup %523 }
 0x29a   : > { %v304_v46 = vmul.f32 %v524_v45, %v520_v33 }
 0x29b   : > { %307 = vperm.xlu0 %516, %v302_v44  }
 0x29f   : > { %312 = vperm.xlu0 %516, %v304_v46  }
 0x31a   : > { %v308_v47 = vpop.permute.xlu0 %307 }
 0x31b   : > { %v315_v48 = vmul.f32 %v308_v47, %v785_v1 }
 0x31d   : > { %v317_v49 = vsel %vm221_vm0, %v315_v48, 0.0 }
 0x31e   : > { %v318_v50 = vrot.slane %v317_v49, 4  ;;  %v313_v51 = vpop.permute.xlu0 %312 }
 0x31f   : > { %v316_v52 = vmul.f32 %v313_v51, %v790_v3 }
 0x320   : > { %v319_v53 = vadd.f32 %v318_v50, %v317_v49 }
 0x321   : > { %v324_v54 = vsel %vm221_vm0, %v316_v52, 0.0 }
 0x322   : > { %v320_v55 = vrot.slane %v319_v53, 2  ;;  %v325_v56 = vrot.slane %v324_v54, 4 }
 0x324   : > { %v321_v57 = vadd.f32 %v320_v55, %v319_v53  ;;  %v326_v58 = vadd.f32 %v325_v56, %v324_v54 }
 0x326   : > { %v327_v59 = vrot.slane %v326_v58, 2  ;;  %v322_v60 = vrot.slane %v321_v57, 1 }
 0x328   : > { %v328_v61 = vadd.f32 %v327_v59, %v326_v58  ;;  %v323_v63 = vadd.f32 %v322_v60, %v321_v57 }
 0x32a   : > { %v329_v62 = vrot.slane %v328_v61, 1 }
 0x32c   : > { %v330_v0 = vadd.f32 %v329_v62, %v328_v61 }
 0x32e   : > { %v333_v1 = vsel %vm245_vm1, %v330_v0, %v323_v63 }
 0x32f   : > { %336 = vst.msk [vmem:[%s208_s22] sm:$0x3] %vm335_vm3, %v333_v1 }
 0x330   : > { %568 = shalt.err (!%p565_p2)
}
 0x331   : > { %s569_s12 = scalar_lea.hbm %s809_s30, 32  ;;  %s573_s20 = scalar_lea.hbm %s861_s3, 256 }
 0x332   : > { %p570_p4 = scmp.ne.s32.totalorder %s809_s30, %s569_s12  ;;  %p574_p1 = scmp.lt.u32.totalorder %s809_s30, %s861_s3 }
 0x333   : > { %p575_p3 = scmp.lt.u32.totalorder %s573_s20, %s569_s12  ;;  %p577_p8 = scmp.lt.u32.totalorder %s569_s12, %s809_s30 }
 0x334   : > { %p571_p5 = pnand %p570_p4, %p868_p9 }
 0x335   : > { %p576_p7 = por %p575_p3, %p574_p1 }
 0x336   : > { %p572_p6 = pneg %p571_p5 }
 0x337   : > { %p578_p11 = por %p577_p8, %p576_p7 }
 0x339   : > { %p579_p13 = pnand %p578_p11, %p572_p6 }
 0x33b   : > { %582 = shalt.err (!%p579_p13)
}
 0x33c   : > { %451 = dma.vmem_to_hbm [thread:$0]  (%p868_p9), %s811_s23, 32, %s809_s30, %s338_s4  }
 0x33d PF: > { %p462_p10 = scmp.ge.s32.totalorder %s637_s19, 2  ;;  %s364_s25 = sand.u32 1, %s617_s14  }
 0x33e   : > { %p869_p12 = scmp.ne.s32.totalorder %s866_s28, 0  ;;  %s365_s10 = scalar_lea.sflag [#allocation5], %s364_s25 }
 0x340   : > { %p458_p0 = pnand %p462_p10, %p869_p12 }
 0x342   : > { %612 = dma.done.wait (!%p458_p0), %s365_s10, 32  }
 0x343   : > { %614 = vsyncadd (!%p458_p0), %s365_s10, 4294967264  ;;  %s21_s19 = sadd.s32 1, %s637_s19   ;;  %s870_s14 = smov %s621_s15 }
 0x344   : > { %p18_p2 = scmp.ge.s32.totalorder %s21_s19, 10   ;;  %s871_s15 = smov %s625_s16 }
 0x345   : > { %s872_s16 = smov %s724_s27  ;;  %s873_s17 = smov %s633_s18 }
 0x346   : > { %s874_s18 = smov %s876_s21  ;;  %20 = sbr.rel (!%p18_p2) target bundleno = 9 (0x9), region = 77 }
 0x34d   :  { %370 = vsyncpa [#allocation4], 1 }
 0x34e   :  { %372 = vsyncpa [#allocation4 + $0x1], 1 }
 0x34f   :  { %373 = vsyncpa [#allocation5], 1 }
 0x350   :  { %375 = vsyncpa [#allocation5 + $0x1], 1 }

</bundles_post_ra>
